<compile_context>
chip_gen: v7x
topology: tpu7x:2x2x1
jax: 0.10.0
libtpu: 0.0.40
codegen_flags: <defaults>
</compile_context>

<pallas_src>
import functools

import jax
import jax.numpy as jnp
from jax.experimental import pallas as pl
from jax.experimental.pallas import tpu as pltpu


_LANE = 128          # lane-dense output slab width (TPU lane count)
_H1, _H2 = 16, 32    # encoder hidden sizes from the PyTorch module


def _round_up(n, m):
    return ((n + m - 1) // m) * m


def _hybrid_policy_kernel(x_ref, p_ref, out_ref, *, obs, off):
    """One fused forward step for a (TILE_B, obs) batch tile.

    p_ref is a single packed (rows, 128) parameter slab (row offsets are
    multiples of 8):
      w1       rows [off.w1, off.w1+obs)   cols [0, 16)
      b1       row   off.b1                cols [0, 16)
      w2       rows [off.w2, off.w2+16)    cols [0, 32)
      b2       row   off.b2                cols [0, 32)
      w_heads  rows [off.wh, off.wh+32)    cols [0, 128)   (wt|wm, zero-padded)
      b_heads  row   off.bh                cols [0, 128)   (bt|bm, zero-padded)
    Output slab = [logit | mu | zero-pad] -> one unmasked lane-dense store.
    """
    f32 = jnp.float32
    mm_dtype = p_ref.dtype  # f32, or bf16 when use_bf16_matmul=True

    w1 = p_ref[off["w1"]:off["w1"] + obs, 0:_H1]
    b1 = p_ref[off["b1"]:off["b1"] + 1, 0:_H1].astype(f32)
    w2 = p_ref[off["w2"]:off["w2"] + _H1, 0:_H2]
    b2 = p_ref[off["b2"]:off["b2"] + 1, 0:_H2].astype(f32)
    wh = p_ref[off["wh"]:off["wh"] + _H2, :]           # (32, 128), lane-padded heads
    bh = p_ref[off["bh"]:off["bh"] + 1, :].astype(f32)

    x = x_ref[...].astype(mm_dtype)

    # encoder: Linear(obs,16) -> ReLU -> Linear(16,32) -> ReLU  (elementwise in f32)
    h1 = jnp.dot(x, w1, preferred_element_type=f32) + b1
    h1 = jnp.maximum(h1, 0.0)
    h2 = jnp.dot(h1.astype(mm_dtype), w2, preferred_element_type=f32) + b2
    h2 = jnp.maximum(h2, 0.0)

    # fused heads: a single matmul produces [logit | mu | 0] in the 128-wide slab
    out_ref[...] = (
        jnp.dot(h2.astype(mm_dtype), wh, preferred_element_type=f32) + bh
    ).astype(out_ref.dtype)


def pack_params(params, obs, k_type, k_args):
    """Pack all parameters into one (rows, 128) f32 slab; sub-arrays start at
    row offsets that are multiples of 8 (f32 sublane)."""
    n_heads = k_type + k_args
    assert n_heads <= _LANE, "fused head width must fit in one 128-lane slab"

    off_w1 = 0
    off_b1 = _round_up(obs, 8)
    off_w2 = off_b1 + 8
    off_b2 = off_w2 + _H1
    off_wh = off_b2 + 8
    off_bh = off_wh + _H2
    rows = _round_up(off_bh + 1, 8)

    buf = jnp.zeros((rows, _LANE), jnp.float32)
    buf = buf.at[off_w1:off_w1 + obs, 0:_H1].set(params["w1"])
    buf = buf.at[off_b1, 0:_H1].set(params["b1"][0])
    buf = buf.at[off_w2:off_w2 + _H1, 0:_H2].set(params["w2"])
    buf = buf.at[off_b2, 0:_H2].set(params["b2"][0])
    w_heads = jnp.concatenate([params["wt"], params["wm"]], axis=1)   # (32, kt+ka)
    b_heads = jnp.concatenate([params["bt"], params["bm"]], axis=1)   # (1,  kt+ka)
    buf = buf.at[off_wh:off_wh + _H2, 0:n_heads].set(w_heads)
    buf = buf.at[off_bh, 0:n_heads].set(b_heads[0])

    off = dict(w1=off_w1, b1=off_b1, w2=off_w2, b2=off_b2, wh=off_wh, bh=off_bh)
    return buf, off


def hybrid_policy_forward(x, params, *, tile_b=512, use_bf16_matmul=False):
    """Full forward pass: one Pallas kernel over a batch grid + cheap wrapper slices."""
    B, obs = x.shape
    k_type = params["wt"].shape[1]
    k_args = params["wm"].shape[1]

    p_buf, off = pack_params(params, obs, k_type, k_args)

    # Batch tiling: TILE_B multiple of 8 (f32 sublane); pad B up to a multiple
    # of the tile only when needed (single-tile small batches pad at most to 8).
    tile_b = min(_round_up(tile_b, 8), _round_up(B, 8))
    b_pad = _round_up(B, tile_b)
    if b_pad != B:
        x = jnp.pad(x, ((0, b_pad - B), (0, 0)))

    if use_bf16_matmul:
        # v6e/v7x large-batch path: halves HBM traffic for x (the only array
        # scaling with B); accumulation/elementwise remain f32 in the kernel.
        x_in = x.astype(jnp.bfloat16)
        p_in = p_buf.astype(jnp.bfloat16)
    else:
        x_in, p_in = x, p_buf

    kernel = functools.partial(_hybrid_policy_kernel, obs=obs, off=off)

    heads = pl.pallas_call(
        kernel,
        out_shape=jax.ShapeDtypeStruct((b_pad, _LANE), jnp.float32),
        grid_spec=pltpu.PrefetchScalarGridSpec(
            num_scalar_prefetch=0,
            grid=(b_pad // tile_b,),
            in_specs=[
                pl.BlockSpec((tile_b, obs), lambda i: (i, 0)),   # batch tile of x
                pl.BlockSpec(p_buf.shape, lambda i: (0, 0)),     # resident param slab
            ],
            out_specs=pl.BlockSpec((tile_b, _LANE), lambda i: (i, 0)),
        ),
        compiler_params=pltpu.CompilerParams(
            dimension_semantics=("parallel",),   # shard batch tiles across TCs (v7x)
        ),
    )(x_in, p_in)

    logit = heads[:B, :k_type]
    mu = heads[:B, k_type:k_type + k_args]
    # sigma is state-independent: exp(log_sigma + zeros_like(mu)) == broadcast(exp(log_sigma))
    sigma = jnp.broadcast_to(jnp.exp(params["log_sigma"]), (B, k_args))
    # TODO(synk): the PyTorch module wraps the result with ttorch.as_tensor; a plain dict is returned here.
    return {"action_type": logit, "action_args": {"mu": mu, "sigma": sigma}}


def init_params(key, obs_shape, action_type_shape, action_args_shape):
    """PyTorch-style Linear init: U(-1/sqrt(fan_in), 1/sqrt(fan_in)).
    Weights stored as (in, out); biases as (1, out)."""
    def linear(key, fan_in, fan_out):
        kw, kb = jax.random.split(key)
        bound = 1.0 / jnp.sqrt(fan_in)
        w = jax.random.uniform(kw, (fan_in, fan_out), jnp.float32, -bound, bound)
        b = jax.random.uniform(kb, (1, fan_out), jnp.float32, -bound, bound)
        return w, b

    k1, k2, k3, k4 = jax.random.split(key, 4)
    w1, b1 = linear(k1, obs_shape, _H1)
    w2, b2 = linear(k2, _H1, _H2)
    wt, bt = linear(k3, _H2, action_type_shape)
    wm, bm = linear(k4, _H2, action_args_shape)
    log_sigma = jnp.zeros((1, action_args_shape), jnp.float32)
    return dict(w1=w1, b1=b1, w2=w2, b2=b2, wt=wt, bt=bt, wm=wm, bm=bm,
                log_sigma=log_sigma)


def reference_forward(x, p):
    h1 = jnp.maximum(x @ p["w1"] + p["b1"], 0.0)
    h2 = jnp.maximum(h1 @ p["w2"] + p["b2"], 0.0)
    logit = h2 @ p["wt"] + p["bt"]
    mu = h2 @ p["wm"] + p["bm"]
    sigma = jnp.exp(p["log_sigma"] + jnp.zeros_like(mu))
    return logit, mu, sigma


if __name__ == "__main__":
    obs_shape = 10
    action_type_shape = 4
    action_args_shape = 6
    batch = 8

    key = jax.random.PRNGKey(0)
    k_params, k_x = jax.random.split(key)
    params = init_params(k_params, obs_shape, action_type_shape, action_args_shape)
    x = jax.random.normal(k_x, (batch, obs_shape), jnp.float32)

    out = hybrid_policy_forward(x, params)
    jax.block_until_ready(out)

    ref_logit, ref_mu, ref_sigma = reference_forward(x, params)
    assert jnp.allclose(out["action_type"], ref_logit, atol=1e-5, rtol=1e-5)
    assert jnp.allclose(out["action_args"]["mu"], ref_mu, atol=1e-5, rtol=1e-5)
    assert jnp.allclose(out["action_args"]["sigma"], ref_sigma, atol=1e-5, rtol=1e-5)

    # also exercise the multi-tile grid + batch-padding path (B not a tile multiple)
    batch2 = 300
    x2 = jax.random.normal(jax.random.PRNGKey(1), (batch2, obs_shape), jnp.float32)
    out2 = hybrid_policy_forward(x2, params, tile_b=128)
    jax.block_until_ready(out2)
    r_logit2, r_mu2, r_sigma2 = reference_forward(x2, params)
    assert jnp.allclose(out2["action_type"], r_logit2, atol=1e-5, rtol=1e-5)
    assert jnp.allclose(out2["action_args"]["mu"], r_mu2, atol=1e-5, rtol=1e-5)
    assert jnp.allclose(out2["action_args"]["sigma"], r_sigma2, atol=1e-5, rtol=1e-5)

    print("KERNEL_OK")
</pallas_src>

<mosaic_0001>
module attributes {stable_mosaic.version = 11 : i64} {
  func.func @_hybrid_policy_kernel(%arg0: i32, %arg1: memref<8x10xf32, #tpu.memory_space<vmem>>, %arg2: memref<88x128xf32, #tpu.memory_space<vmem>>, %arg3: memref<8x128xf32, #tpu.memory_space<vmem>>) attributes {dimension_semantics = [#tpu.dimension_semantics<parallel>], iteration_bounds = array<i64: 1>, scalar_prefetch = 0 : i64, scratch_operands = 0 : i64, tpu.core_type = #tpu.core_type<tc>, window_params = [{transform_indices = @transform_0, window_bounds = array<i64: 8, 10>}, {pipeline_mode = #tpu.pipeline_mode<synchronous>, transform_indices = @transform_1, window_bounds = array<i64: 88, 128>}, {transform_indices = @transform_2, window_bounds = array<i64: 8, 128>}]} {
    %c0 = arith.constant 0 : index
    %c0_0 = arith.constant 0 : index
    %0 = vector.load %arg2[%c0, %c0_0] : memref<88x128xf32, #tpu.memory_space<vmem>>, vector<10x16xf32>
    %c16 = arith.constant 16 : index
    %c0_1 = arith.constant 0 : index
    %1 = vector.load %arg2[%c16, %c0_1] : memref<88x128xf32, #tpu.memory_space<vmem>>, vector<1x16xf32>
    %c24 = arith.constant 24 : index
    %c0_2 = arith.constant 0 : index
    %2 = vector.load %arg2[%c24, %c0_2] : memref<88x128xf32, #tpu.memory_space<vmem>>, vector<16x32xf32>
    %c40 = arith.constant 40 : index
    %c0_3 = arith.constant 0 : index
    %3 = vector.load %arg2[%c40, %c0_3] : memref<88x128xf32, #tpu.memory_space<vmem>>, vector<1x32xf32>
    %c48 = arith.constant 48 : index
    %c0_4 = arith.constant 0 : index
    %4 = vector.load %arg2[%c48, %c0_4] : memref<88x128xf32, #tpu.memory_space<vmem>>, vector<32x128xf32>
    %c80 = arith.constant 80 : index
    %c0_5 = arith.constant 0 : index
    %5 = vector.load %arg2[%c80, %c0_5] : memref<88x128xf32, #tpu.memory_space<vmem>>, vector<1x128xf32>
    %c0_6 = arith.constant 0 : index
    %c0_7 = arith.constant 0 : index
    %6 = vector.load %arg1[%c0_6, %c0_7] : memref<8x10xf32, #tpu.memory_space<vmem>>, vector<8x10xf32>
    %cst = arith.constant dense<0.000000e+00> : vector<8x16xf32>
    %7 = tpu.matmul %6, %0, %cst {dimension_numbers = #tpu.dot_dimension_numbers<[1], [0], [0], [1], [0, 0, 1, 1], [], []>} : vector<8x10xf32>, vector<10x16xf32>, vector<8x16xf32> -> vector<8x16xf32>
    %8 = vector.broadcast %1 : vector<1x16xf32> to vector<8x16xf32>
    %9 = arith.addf %7, %8 : vector<8x16xf32>
    %cst_8 = arith.constant 0.000000e+00 : f32
    %10 = vector.broadcast %cst_8 : f32 to vector<8x16xf32>
    %11 = arith.maximumf %9, %10 : vector<8x16xf32>
    %cst_9 = arith.constant dense<0.000000e+00> : vector<8x32xf32>
    %12 = tpu.matmul %11, %2, %cst_9 {dimension_numbers = #tpu.dot_dimension_numbers<[1], [0], [0], [1], [0, 0, 1, 1], [], []>} : vector<8x16xf32>, vector<16x32xf32>, vector<8x32xf32> -> vector<8x32xf32>
    %13 = vector.broadcast %3 : vector<1x32xf32> to vector<8x32xf32>
    %14 = arith.addf %12, %13 : vector<8x32xf32>
    %cst_10 = arith.constant 0.000000e+00 : f32
    %15 = vector.broadcast %cst_10 : f32 to vector<8x32xf32>
    %16 = arith.maximumf %14, %15 : vector<8x32xf32>
    %cst_11 = arith.constant dense<0.000000e+00> : vector<8x128xf32>
    %17 = tpu.matmul %16, %4, %cst_11 {dimension_numbers = #tpu.dot_dimension_numbers<[1], [0], [0], [1], [0, 0, 1, 1], [], []>} : vector<8x32xf32>, vector<32x128xf32>, vector<8x128xf32> -> vector<8x128xf32>
    %18 = vector.broadcast %5 : vector<1x128xf32> to vector<8x128xf32>
    %19 = arith.addf %17, %18 : vector<8x128xf32>
    %c0_12 = arith.constant 0 : index
    %c0_13 = arith.constant 0 : index
    %20 = vector.load %arg3[%c0_12, %c0_13] : memref<8x128xf32, #tpu.memory_space<vmem>>, vector<8x128xf32>
    tpu.vector_store %arg3[%c0_12, %c0_13], %19 {strides = array<i32>} : memref<8x128xf32, #tpu.memory_space<vmem>>, vector<8x128xf32>,
    return
  }
  func.func @transform_0(%arg0: i32) -> (i32, i32) {
    %c0_i32 = arith.constant 0 : i32
    %c0_i32_0 = arith.constant 0 : i32
    return %arg0, %c0_i32 : i32, i32
  }
  func.func @transform_1(%arg0: i32) -> (i32, i32) {
    %c0_i32 = arith.constant 0 : i32
    %c0_i32_0 = arith.constant 0 : i32
    %c0_i32_1 = arith.constant 0 : i32
    return %c0_i32, %c0_i32_0 : i32, i32
  }
  func.func @transform_2(%arg0: i32) -> (i32, i32) {
    %c0_i32 = arith.constant 0 : i32
    %c0_i32_0 = arith.constant 0 : i32
    return %arg0, %c0_i32 : i32, i32
  }
}

</mosaic_0001>

<bundles_post_ra>
// kernel: tpu_custom_call.1
= control target key start
LH: loop header
LB: loop body
LE: loop exit
PB: predicated region body
PF: predicated region fallthrough
CT: control target
= control target key end

     0   :  { %7 = vsyncpa [#allocation3], 0  ;;  %s511_s0 = inlined_call_operand.hbm [shape: f32[8,10], index: 0, kind: input, shape index: {}]   ;;  %s512_s1 = inlined_call_operand.hbm [shape: f32[88,128], index: 1, kind: input, shape index: {}]   ;;  %s513_s2 = inlined_call_operand.hbm [shape: f32[8,128], index: 2, kind: output, shape index: {}]  }
   0x1   :  { %8 = vsyncpa [#allocation6], 0 }
   0x2   :  { %9 = vsyncpa [#allocation4], 0  ;;  %s444_s9 = smov [#allocation2]   ;;  %s445_s11 = smov [#allocation5]  }
   0x3   :  { %s16_s10 = sshll.u32 %s444_s9, 4  ;;  %s25_s12 = sshll.u32 %s445_s11, 4  ;;  %s17_s10 = int_to_ptr.vmem [resolvable:$true] %s16_s10  ;;  %s468_s12 = int_to_ptr.vmem [resolvable:$true] %s25_s12 }
   0x4   :  { %s372_s15 = scalar_lea.hbm %s511_s0, 128 }
   0x5   :  { %p373_p0 = scmp.ne.s32.totalorder %s511_s0, %s372_s15  ;;  %p376_p1 = scmp.lt.u32.totalorder %s372_s15, %s511_s0 }
   0x7   :  { %p378_p2 = pnand %p376_p1, %p373_p0 }
   0x9   :  { %381 = shalt.err (!%p378_p2)
}
   0xa   :  { %s382_s20 = scalar_lea.vmem %s17_s10, 128  ;;  %p387_p4 = scmp.lt.s32.totalorder %s17_s10, %s17_s10 }
   0xb   :  { %p383_p3 = scmp.ne.s32.totalorder %s17_s10, %s382_s20  ;;  %p388_p5 = scmp.lt.s32.totalorder %s382_s20, %s382_s20 }
   0xd   :  { %p389_p6 = por %p388_p5, %p387_p4 }
   0xf   :  { %p390_p7 = pnand %p389_p6, %p383_p3 }
  0x11   :  { %393 = shalt.err (!%p390_p7)
}
  0x12   :  { %19 = dma.hbm_to_vmem [thread:$0]  %s511_s0, 128, %s17_s10, [#allocation3]  }
  0x13   :  { %s394_s25 = scalar_lea.hbm %s512_s1, 1408 }
  0x14   :  { %p395_p8 = scmp.ne.s32.totalorder %s512_s1, %s394_s25  ;;  %p398_p9 = scmp.lt.u32.totalorder %s394_s25, %s512_s1 }
  0x16   :  { %p400_p10 = pnand %p398_p9, %p395_p8 }
  0x18   :  { %403 = shalt.err (!%p400_p10)
}
  0x19   :  { %s404_s30 = scalar_lea.vmem %s468_s12, 1408  ;;  %p409_p12 = scmp.lt.s32.totalorder %s468_s12, %s468_s12 }
  0x1a   :  { %p405_p11 = scmp.ne.s32.totalorder %s468_s12, %s404_s30  ;;  %p410_p13 = scmp.lt.s32.totalorder %s404_s30, %s404_s30 }
  0x1c   :  { %p411_p0 = por %p410_p13, %p409_p12 }
  0x1e   :  { %p412_p1 = pnand %p411_p0, %p405_p11 }
  0x20   :  { %415 = shalt.err (!%p412_p1)
}
  0x21   :  { %s446_s0 = smov 128   ;;  %s447_s3 = smov 8  }
  0x22   :  { %31 = dma.hbm_to_vmem [thread:$0]  %s512_s1, 1408, %s468_s12, [#allocation6], %s446_s0, %s446_s0, %s447_s3  }
  0x23   :  { %438 = dma.done.wait [#allocation3], 128  }
  0x24   :  { %439 = vsyncadd [#allocation3], 4294967168 }
  0x25   :  { %440 = dma.done.wait [#allocation6], 1408  }
  0x26   :  { %441 = vsyncadd [#allocation6], 4294965888  ;;  %v448_v0 = vmov 0.0|0.0   ;;  %vm449_vm0 = vmmov 0   ;;  %v450_v1 = vmov 0.0   ;;  %vm58_vm1 = vcmask 1041408  }
  0x27   :  { %350 = vmatprep.subr.bf16.mxu1 %v448_v0  ;;  %357 = vmatprep.subr.bf16.mxu0 %v448_v0  ;;  %v38_v2 = vld [vmem:[#allocation5] sm:$0xff]  ;;  %v39_v3 = vld [vmem:[#allocation5 + $0x8] sm:$0x3]  ;;  %vm451_vm2 = vmmov 1   ;;  %v49_v5 = vld [vmem:[#allocation2] sm:$0xff]  ;;  %vm54_vm4 = vcmask 80896  }
  0x28   :  { %329 = vmatprep.mubr.msk.f32.mxu1 %vm449_vm0, %v450_v1  ;;  %347 = vmatprep.mubr.msk.f32.mxu0 %vm449_vm0, %v450_v1  ;;  %vm352_vm3 = vmpackc.low %vm58_vm1, %vm451_vm2  ;;  %v351_v4 = vpack.c.bf16 %v39_v3, %v38_v2  ;;  %v41_v6 = vld [vmem:[#allocation5 + $0x18] sm:$0xff]  ;;  %v42_v7 = vld [vmem:[#allocation5 + $0x20] sm:$0xff]  ;;  %vm137_vm5 = vcmask 130048   ;;  %vm216_vm6 = vcmask 261120   ;;  %s452_s1 = smov [#allocation7]  }
  0x29   :  { %v355_v8 = vpack.c.bf16 %v42_v7, %v41_v6  ;;  %v44_v9 = vld [vmem:[#allocation5 + $0x30] sm:$0xff]  ;;  %v45_v10 = vld [vmem:[#allocation5 + $0x38] sm:$0xff]  ;;  %v46_v17 = vld [vmem:[#allocation5 + $0x40] sm:$0xff]  ;;  %s297_s6 = sshll.u32 %s452_s1, 4  ;;  %s298_s6 = int_to_ptr.vmem [resolvable:$true] %s297_s6 }
  0x2a   :  { %353 = vmatpush3.bf16.msk.msra.mxu1 %vm352_vm3, %v351_v4  ;;  %v358_v11 = vpack.c.bf16 %v45_v10, %v44_v9  ;;  %v307_v12 = vld [vmem:[#allocation5 + $0x10] ss:$0 sm:$0xff]  ;;  %v47_v18 = vld [vmem:[#allocation5 + $0x48] sm:$0xff]  ;;  %s416_s7 = scalar_lea.vmem %s298_s6, 128  ;;  %p421_p3 = scmp.lt.s32.totalorder %s298_s6, %s298_s6 }
  0x2b   :  { %354 = vmatprep.subr.bf16.mxu1 %v448_v0  ;;  %v361_v19 = vpack.c.bf16 %v47_v18, %v46_v17  ;;  %v310_v20 = vld [vmem:[#allocation5 + $0x28] ss:$0 sm:$0xff]  ;;  %v312_v25 = vld [vmem:[#allocation5 + $0x50] ss:$0 sm:$0xff]  ;;  %p417_p2 = scmp.ne.s32.totalorder %s298_s6, %s416_s7  ;;  %p422_p4 = scmp.lt.s32.totalorder %s416_s7, %s416_s7 }
  0x2c   :  { %359 = vmatpush3.bf16.msra.mxu0 %v358_v11 }
  0x2d   :  { %330 = vmatmul.mubr.msk.f32.vlgmr.msra.gmra.mrb[0].mxu1 %vm54_vm4, %v49_v5  ;;  %360 = vmatprep.subr.bf16.mxu0 %v448_v0  ;;  %p423_p5 = por %p422_p4, %p421_p3 }
  0x2e   :  { %336 = vmatprep.mubr.msk.f32.mxu1 %vm449_vm0, %v450_v1  ;;  %356 = vmatpush3.bf16.msra.mxu1 %v355_v8 }
  0x2f   :  { %p424_p6 = pnand %p423_p5, %p417_p2 }
  0x30   :  { %362 = vmatpush3.bf16.msra.mxu0 %v361_v19 }
 0x100   :  { %v128_v13 = vpop.f32.mrb[0].mxu1 }
 0x101   :  { %v129_v14 = vadd.f32 %v307_v12, %v128_v13  ;;  %v331_v15 = vpop.f32.mrb[1].mxu1 }
 0x103   :  { %v132_v16 = vmax.f32 %v129_v14, 0.0 }
 0x105   :  { %337 = vmatmul.mubr.msk.f32.vlgmr.msra.gmra.mrb[2].mxu1 %vm137_vm5, %v132_v16 }
 0x1d8   :  { %v207_v21 = vpop.f32.mrb[2].mxu1 }
 0x1d9   :  { %v208_v22 = vadd.f32 %v310_v20, %v207_v21  ;;  %v338_v23 = vpop.f32.mrb[3].mxu1 }
 0x1db   :  { %v211_v24 = vmax.f32 %v208_v22, 0.0 }
 0x1dd   :  { %348 = vmatmul.mubr.msk.f32.vlgmr.msra.gmra.mrb[0].mxu0 %vm216_vm6, %v211_v24 }
 0x2b0   :  { %v286_v26 = vpop.f32.mrb[0].mxu0 }
 0x2b1   :  { %v287_v27 = vadd.f32 %v312_v25, %v286_v26  ;;  %v349_v28 = vpop.f32.mrb[1].mxu0 }
 0x2b3   :  { %290 = vst [vmem:[#allocation7] sm:$0xff] %v287_v27 }
 0x2b4   :  { %427 = shalt.err (!%p424_p6)
}
 0x2b5   :  { %s428_s10 = scalar_lea.hbm %s513_s2, 128 }
 0x2b6   :  { %p429_p7 = scmp.ne.s32.totalorder %s513_s2, %s428_s10  ;;  %p432_p8 = scmp.lt.u32.totalorder %s428_s10, %s513_s2 }
 0x2b8   :  { %p434_p9 = pnand %p432_p8, %p429_p7 }
 0x2ba   :  { %437 = shalt.err (!%p434_p9)
}
 0x2bb   :  { %300 = dma.vmem_to_hbm [thread:$0]  %s298_s6, 128, %s513_s2, [#allocation4]  }
 0x2bc   :  { %442 = dma.done.wait [#allocation4], 128  }
 0x2bd   :  { %443 = vsyncadd [#allocation4], 4294967168 }
 0x2be   :  { %304 = vsyncpa [#allocation3], 1 }
 0x2bf   :  { %305 = vsyncpa [#allocation6], 1 }
 0x2c0   :  { %306 = vsyncpa [#allocation4], 1 }

</bundles_post_ra>
